<compile_context>
chip_gen: v5e
topology: v5e:2x2
jax: 0.10.0
libtpu: 0.0.40
codegen_flags: <defaults>
</compile_context>

<pallas_src>
import jax
import jax.numpy as jnp
from jax.experimental import pallas as pl
from jax.experimental.pallas import tpu as pltpu

EPS = 1e-6


def tm_loss_kernel(logits_ref, tp_ref, out_ref):
    bb, T, V = logits_ref.shape
    # Static unroll over the packed sub-batch (bb == 1 at production shapes;
    # bb > 1 only when T*V and (V-1)^2 are tiny, to amortize the ~0.35 us
    # per-grid-step overhead that dominates at V=16).
    for b in range(bb):
        # ---- softmax over vocab (dim=2 in the PyTorch module) ----
        x = logits_ref[b].astype(jnp.float32)                     # (T, V)
        x = x - jnp.max(x, axis=-1, keepdims=True)
        e = jnp.exp(x)
        probs = e * pl.reciprocal(jnp.sum(e, axis=-1, keepdims=True))

        # ---- time shift: p2[t] = probs[t+1] for t < T-1, 0 at t = T-1 ----
        # roll keeps both MXU operands (T, V)-aligned; the wrap-around row
        # (pairing probs[T-1] with probs[0]) is zeroed with one (T, V) mask.
        p2 = pltpu.roll(probs, shift=T - 1, axis=0)               # probs[(t+1) % T]
        row_ids = jax.lax.broadcasted_iota(jnp.int32, (T, V), 0)
        p2 = jnp.where(row_ids < T - 1, p2, 0.0)

        # ---- bigram: einsum('ti,tj->ij', probs[:-1], probs[1:]) on the MXU ----
        bigram = jax.lax.dot_general(
            probs, p2, (((0,), (0,)), ((), ())),
            preferred_element_type=jnp.float32)                   # (V, V)

        # ---- [:-1, :-1] slice (zero-offset, no relayout) + clamped row sums --
        bigram_v = bigram[:V - 1, :V - 1]                         # (V-1, V-1)
        row_sums = jnp.maximum(
            jnp.sum(bigram_v, axis=-1, keepdims=True), 1.0)       # (V-1, 1)

        # pred = bigram_v/row_sums + EPS == (bigram_v + EPS*row_sums)/row_sums
        # => exactly one log per bigram element + one log per row; no divide,
        # no per-element reciprocal.
        log_pred = jnp.log(bigram_v + EPS * row_sums) - jnp.log(row_sums)

        # ---- cross term of KL(true || pred): sum(tp * log(pred)) ----
        # (+EPS kept in f32 so 1e-6 is not washed out.)
        tp = tp_ref[b].astype(jnp.float32) + EPS                  # (V-1, V-1)
        cross = jnp.sum(tp * log_pred, axis=(0, 1), keepdims=True)  # (1, 1)

        # Lane-dense per-batch partial; entropy term + batch mean done outside.
        out_ref[b] = jnp.broadcast_to(cross, out_ref.shape[1:]).astype(out_ref.dtype)


def _vmem_limit_bytes():
    """~75% of physical VMEM (48 MiB on v7x, 96 MiB on v5e/v6e); None if unknown."""
    try:
        cap = getattr(pltpu.get_tpu_info(), "vmem_capacity_bytes", None)
        if not cap:
            return None
        return min(int(cap) * 3 // 4, 100 * 1024 * 1024)
    except Exception:
        return None


def tm_loss(logits, true_probs, *, batch_block=None):
    """logits: (B, T, V); true_probs: (B, V-1, V-1) -> scalar f32."""
    B, T, V = logits.shape
    assert true_probs.shape == (B, V - 1, V - 1)

    if batch_block is None:
        # Pack batch elements per grid step only when each element is tiny
        # (at V=16 every vreg is 16/128 lane-filled and per-step overhead
        # dominates).  Production V/T keeps one element per step.
        batch_block = B if (T * V <= 128 * 128 and (V - 1) ** 2 <= 128 * 128) else 1
    if batch_block < 1 or B % batch_block != 0:
        batch_block = 1
    bb = batch_block

    cross = pl.pallas_call(
        tm_loss_kernel,
        out_shape=jax.ShapeDtypeStruct((B, 1, 128), jnp.float32),
        grid_spec=pltpu.PrefetchScalarGridSpec(
            num_scalar_prefetch=0,
            grid=(B // bb,),
            in_specs=[
                # logits in their native dtype (cast to f32 inside the kernel)
                pl.BlockSpec((bb, T, V), lambda i: (i, 0, 0)),
                # true_probs unpadded, full-extent last two dims
                pl.BlockSpec((bb, V - 1, V - 1), lambda i: (i, 0, 0)),
            ],
            out_specs=pl.BlockSpec((bb, 1, 128), lambda i: (i, 0, 0)),
        ),
        compiler_params=pltpu.CompilerParams(
            dimension_semantics=("parallel",),        # batch shards across TCs
            vmem_limit_bytes=_vmem_limit_bytes(),
        ),
    )(logits, true_probs)

    cross = cross[:, 0, 0]                                        # (B,)

    # Entropy term sum(tp*log(tp)) is logits-independent: computed once here
    # (plain XLA) instead of burning in-kernel EUP slots on it.
    tp = true_probs.astype(jnp.float32) + EPS
    entropy = jnp.sum(tp * jnp.log(tp), axis=(-2, -1))            # (B,)

    # KL(true || pred) = sum(tp*log(tp)) - sum(tp*log(pred)); mean over batch.
    return jnp.mean(entropy - cross)


def tm_loss_ref(logits, true_probs, eps=EPS):
    """Pure-JAX reference mirroring the PyTorch module."""
    probs = jax.nn.softmax(logits.astype(jnp.float32), axis=2)
    p1, p2 = probs[:, :-1, :], probs[:, 1:, :]
    bigram = jnp.einsum('bti,btj->bij', p1, p2)
    bigram = bigram[:, :-1, :-1]
    row_sums = jnp.maximum(jnp.sum(bigram, axis=-1, keepdims=True), 1.0)
    pred = bigram / row_sums + eps
    tp = true_probs.astype(jnp.float32) + eps
    kl = jnp.sum(tp * (jnp.log(tp) - jnp.log(pred)), axis=(-2, -1))
    return jnp.mean(kl)


if __name__ == "__main__":
    key = jax.random.PRNGKey(0)
    k1, k2 = jax.random.split(key)
    B, T, V = 2, 8, 16
    logits = jax.random.normal(k1, (B, T, V), dtype=jnp.float32)
    true_probs = jax.random.uniform(k2, (B, V - 1, V - 1), dtype=jnp.float32)

    out = jax.block_until_ready(tm_loss(logits, true_probs))
    ref = jax.block_until_ready(tm_loss_ref(logits, true_probs))
    assert jnp.allclose(out, ref, rtol=1e-4, atol=1e-4), (float(out), float(ref))
    print("KERNEL_OK")
</pallas_src>

<mosaic_0001>
module attributes {stable_mosaic.version = 11 : i64} {
  func.func @tm_loss_kernel(%arg0: i32, %arg1: memref<2x8x16xf32, #tpu.memory_space<vmem>>, %arg2: memref<2x15x15xf32, #tpu.memory_space<vmem>>, %arg3: memref<2x1x128xf32, #tpu.memory_space<vmem>>) attributes {dimension_semantics = [#tpu.dimension_semantics<parallel>], iteration_bounds = array<i64: 1>, scalar_prefetch = 0 : i64, scratch_operands = 0 : i64, tpu.core_type = #tpu.core_type<tc>, window_params = [{transform_indices = @transform_0, window_bounds = array<i64: 2, 8, 16>}, {transform_indices = @transform_1, window_bounds = array<i64: 2, 15, 15>}, {transform_indices = @transform_2, window_bounds = array<i64: 2, 1, 128>}]} {
    %c0 = arith.constant 0 : index
    %c0_0 = arith.constant 0 : index
    %c0_1 = arith.constant 0 : index
    %0 = vector.load %arg1[%c0, %c0_0, %c0_1] : memref<2x8x16xf32, #tpu.memory_space<vmem>>, vector<1x8x16xf32>
    %1 = vector.shape_cast %0 : vector<1x8x16xf32> to vector<8x16xf32>
    %cst = arith.constant dense<0xFF800000> : vector<8xf32>
    %2 = vector.multi_reduction <maximumf>, %1, %cst [1] : vector<8x16xf32> to vector<8xf32>
    %3 = vector.shape_cast %2 : vector<8xf32> to vector<8x1xf32>
    %4 = vector.broadcast %3 : vector<8x1xf32> to vector<8x16xf32>
    %5 = arith.subf %1, %4 : vector<8x16xf32>
    %6 = math.exp %5 : vector<8x16xf32>
    %cst_2 = arith.constant dense<0.000000e+00> : vector<8xf32>
    %7 = vector.multi_reduction <add>, %6, %cst_2 [1] : vector<8x16xf32> to vector<8xf32>
    %8 = vector.shape_cast %7 : vector<8xf32> to vector<8x1xf32>
    %9 = tpu.reciprocal %8 : vector<8x1xf32> -> vector<8x1xf32>
    %10 = vector.broadcast %9 : vector<8x1xf32> to vector<8x16xf32>
    %11 = arith.mulf %6, %10 : vector<8x16xf32>
    %c7_i32 = arith.constant 7 : i32
    %12 = tpu.dynamic_rotate %11 by %c7_i32 dim 0 : vector<8x16xf32>, i32 -> vector<8x16xf32>
    %13 = tpu.iota {dimensions = array<i32: 0>} : vector<8x16xi32>
    %c7_i32_3 = arith.constant 7 : i32
    %14 = vector.broadcast %c7_i32_3 : i32 to vector<8x16xi32>
    %15 = arith.cmpi slt, %13, %14 : vector<8x16xi32>
    %cst_4 = arith.constant 0.000000e+00 : f32
    %16 = vector.broadcast %cst_4 : f32 to vector<8x16xf32>
    %17 = arith.select %15, %12, %16 : vector<8x16xi1>, vector<8x16xf32>
    %cst_5 = arith.constant dense<0.000000e+00> : vector<16x16xf32>
    %18 = tpu.matmul %11, %17, %cst_5 {dimension_numbers = #tpu.dot_dimension_numbers<[0], [0], [1], [1], [0, 1, 1, 1], [], []>} : vector<8x16xf32>, vector<8x16xf32>, vector<16x16xf32> -> vector<16x16xf32>
    %19 = vector.extract_strided_slice %18 {offsets = [0, 0], sizes = [15, 15], strides = [1, 1]} : vector<16x16xf32> to vector<15x15xf32>
    %cst_6 = arith.constant dense<0.000000e+00> : vector<15xf32>
    %20 = vector.multi_reduction <add>, %19, %cst_6 [1] : vector<15x15xf32> to vector<15xf32>
    %21 = vector.shape_cast %20 : vector<15xf32> to vector<15x1xf32>
    %cst_7 = arith.constant 1.000000e+00 : f32
    %22 = vector.broadcast %cst_7 : f32 to vector<15x1xf32>
    %23 = arith.maximumf %21, %22 : vector<15x1xf32>
    %cst_8 = arith.constant 9.99999997E-7 : f32
    %24 = vector.broadcast %cst_8 : f32 to vector<15x1xf32>
    %25 = arith.mulf %24, %23 : vector<15x1xf32>
    %26 = vector.broadcast %25 : vector<15x1xf32> to vector<15x15xf32>
    %27 = arith.addf %19, %26 : vector<15x15xf32>
    %28 = math.log %27 : vector<15x15xf32>
    %29 = math.log %23 : vector<15x1xf32>
    %30 = vector.broadcast %29 : vector<15x1xf32> to vector<15x15xf32>
    %31 = arith.subf %28, %30 : vector<15x15xf32>
    %c0_9 = arith.constant 0 : index
    %c0_10 = arith.constant 0 : index
    %c0_11 = arith.constant 0 : index
    %32 = vector.load %arg2[%c0_9, %c0_10, %c0_11] : memref<2x15x15xf32, #tpu.memory_space<vmem>>, vector<1x15x15xf32>
    %33 = vector.shape_cast %32 : vector<1x15x15xf32> to vector<15x15xf32>
    %cst_12 = arith.constant 9.99999997E-7 : f32
    %34 = vector.broadcast %cst_12 : f32 to vector<15x15xf32>
    %35 = arith.addf %33, %34 : vector<15x15xf32>
    %36 = arith.mulf %35, %31 : vector<15x15xf32>
    %37 = vector.shape_cast %36 : vector<15x15xf32> to vector<1x15x15xf32>
    %cst_13 = arith.constant dense<0.000000e+00> : vector<1xf32>
    %38 = vector.multi_reduction <add>, %37, %cst_13 [1, 2] : vector<1x15x15xf32> to vector<1xf32>
    %39 = vector.shape_cast %38 : vector<1xf32> to vector<1x1x1xf32>
    %40 = vector.extract %39[0, 0, 0] : f32 from vector<1x1x1xf32>
    %41 = vector.broadcast %40 : f32 to vector<1x1xf32>
    %42 = vector.shape_cast %41 : vector<1x1xf32> to vector<1x1xf32>
    %43 = vector.broadcast %42 : vector<1x1xf32> to vector<1x128xf32>
    %c0_14 = arith.constant 0 : index
    %c0_15 = arith.constant 0 : index
    %c0_16 = arith.constant 0 : index
    %44 = vector.load %arg3[%c0_14, %c0_15, %c0_16] : memref<2x1x128xf32, #tpu.memory_space<vmem>>, vector<1x1x128xf32>
    %45 = vector.shape_cast %44 : vector<1x1x128xf32> to vector<1x128xf32>
    %46 = vector.shape_cast %43 : vector<1x128xf32> to vector<1x1x128xf32>
    tpu.vector_store %arg3[%c0_14, %c0_15, %c0_16], %46 {strides = array<i32>} : memref<2x1x128xf32, #tpu.memory_space<vmem>>, vector<1x1x128xf32>,
    %c1 = arith.constant 1 : index
    %c0_17 = arith.constant 0 : index
    %c0_18 = arith.constant 0 : index
    %47 = vector.load %arg1[%c1, %c0_17, %c0_18] : memref<2x8x16xf32, #tpu.memory_space<vmem>>, vector<1x8x16xf32>
    %48 = vector.shape_cast %47 : vector<1x8x16xf32> to vector<8x16xf32>
    %cst_19 = arith.constant dense<0xFF800000> : vector<8xf32>
    %49 = vector.multi_reduction <maximumf>, %48, %cst_19 [1] : vector<8x16xf32> to vector<8xf32>
    %50 = vector.shape_cast %49 : vector<8xf32> to vector<8x1xf32>
    %51 = vector.broadcast %50 : vector<8x1xf32> to vector<8x16xf32>
    %52 = arith.subf %48, %51 : vector<8x16xf32>
    %53 = math.exp %52 : vector<8x16xf32>
    %cst_20 = arith.constant dense<0.000000e+00> : vector<8xf32>
    %54 = vector.multi_reduction <add>, %53, %cst_20 [1] : vector<8x16xf32> to vector<8xf32>
    %55 = vector.shape_cast %54 : vector<8xf32> to vector<8x1xf32>
    %56 = tpu.reciprocal %55 : vector<8x1xf32> -> vector<8x1xf32>
    %57 = vector.broadcast %56 : vector<8x1xf32> to vector<8x16xf32>
    %58 = arith.mulf %53, %57 : vector<8x16xf32>
    %c7_i32_21 = arith.constant 7 : i32
    %59 = tpu.dynamic_rotate %58 by %c7_i32_21 dim 0 : vector<8x16xf32>, i32 -> vector<8x16xf32>
    %60 = tpu.iota {dimensions = array<i32: 0>} : vector<8x16xi32>
    %c7_i32_22 = arith.constant 7 : i32
    %61 = vector.broadcast %c7_i32_22 : i32 to vector<8x16xi32>
    %62 = arith.cmpi slt, %60, %61 : vector<8x16xi32>
    %cst_23 = arith.constant 0.000000e+00 : f32
    %63 = vector.broadcast %cst_23 : f32 to vector<8x16xf32>
    %64 = arith.select %62, %59, %63 : vector<8x16xi1>, vector<8x16xf32>
    %cst_24 = arith.constant dense<0.000000e+00> : vector<16x16xf32>
    %65 = tpu.matmul %58, %64, %cst_24 {dimension_numbers = #tpu.dot_dimension_numbers<[0], [0], [1], [1], [0, 1, 1, 1], [], []>} : vector<8x16xf32>, vector<8x16xf32>, vector<16x16xf32> -> vector<16x16xf32>
    %66 = vector.extract_strided_slice %65 {offsets = [0, 0], sizes = [15, 15], strides = [1, 1]} : vector<16x16xf32> to vector<15x15xf32>
    %cst_25 = arith.constant dense<0.000000e+00> : vector<15xf32>
    %67 = vector.multi_reduction <add>, %66, %cst_25 [1] : vector<15x15xf32> to vector<15xf32>
    %68 = vector.shape_cast %67 : vector<15xf32> to vector<15x1xf32>
    %cst_26 = arith.constant 1.000000e+00 : f32
    %69 = vector.broadcast %cst_26 : f32 to vector<15x1xf32>
    %70 = arith.maximumf %68, %69 : vector<15x1xf32>
    %cst_27 = arith.constant 9.99999997E-7 : f32
    %71 = vector.broadcast %cst_27 : f32 to vector<15x1xf32>
    %72 = arith.mulf %71, %70 : vector<15x1xf32>
    %73 = vector.broadcast %72 : vector<15x1xf32> to vector<15x15xf32>
    %74 = arith.addf %66, %73 : vector<15x15xf32>
    %75 = math.log %74 : vector<15x15xf32>
    %76 = math.log %70 : vector<15x1xf32>
    %77 = vector.broadcast %76 : vector<15x1xf32> to vector<15x15xf32>
    %78 = arith.subf %75, %77 : vector<15x15xf32>
    %c1_28 = arith.constant 1 : index
    %c0_29 = arith.constant 0 : index
    %c0_30 = arith.constant 0 : index
    %79 = vector.load %arg2[%c1_28, %c0_29, %c0_30] : memref<2x15x15xf32, #tpu.memory_space<vmem>>, vector<1x15x15xf32>
    %80 = vector.shape_cast %79 : vector<1x15x15xf32> to vector<15x15xf32>
    %cst_31 = arith.constant 9.99999997E-7 : f32
    %81 = vector.broadcast %cst_31 : f32 to vector<15x15xf32>
    %82 = arith.addf %80, %81 : vector<15x15xf32>
    %83 = arith.mulf %82, %78 : vector<15x15xf32>
    %84 = vector.shape_cast %83 : vector<15x15xf32> to vector<1x15x15xf32>
    %cst_32 = arith.constant dense<0.000000e+00> : vector<1xf32>
    %85 = vector.multi_reduction <add>, %84, %cst_32 [1, 2] : vector<1x15x15xf32> to vector<1xf32>
    %86 = vector.shape_cast %85 : vector<1xf32> to vector<1x1x1xf32>
    %87 = vector.extract %86[0, 0, 0] : f32 from vector<1x1x1xf32>
    %88 = vector.broadcast %87 : f32 to vector<1x1xf32>
    %89 = vector.shape_cast %88 : vector<1x1xf32> to vector<1x1xf32>
    %90 = vector.broadcast %89 : vector<1x1xf32> to vector<1x128xf32>
    %c1_33 = arith.constant 1 : index
    %c0_34 = arith.constant 0 : index
    %c0_35 = arith.constant 0 : index
    %91 = vector.load %arg3[%c1_33, %c0_34, %c0_35] : memref<2x1x128xf32, #tpu.memory_space<vmem>>, vector<1x1x128xf32>
    %92 = vector.shape_cast %91 : vector<1x1x128xf32> to vector<1x128xf32>
    %93 = vector.shape_cast %90 : vector<1x128xf32> to vector<1x1x128xf32>
    tpu.vector_store %arg3[%c1_33, %c0_34, %c0_35], %93 {strides = array<i32>} : memref<2x1x128xf32, #tpu.memory_space<vmem>>, vector<1x1x128xf32>,
    return
  }
  func.func @transform_0(%arg0: i32) -> (i32, i32, i32) {
    %c0_i32 = arith.constant 0 : i32
    %c0_i32_0 = arith.constant 0 : i32
    %c0_i32_1 = arith.constant 0 : i32
    return %arg0, %c0_i32, %c0_i32_0 : i32, i32, i32
  }
  func.func @transform_1(%arg0: i32) -> (i32, i32, i32) {
    %c0_i32 = arith.constant 0 : i32
    %c0_i32_0 = arith.constant 0 : i32
    %c0_i32_1 = arith.constant 0 : i32
    return %arg0, %c0_i32, %c0_i32_0 : i32, i32, i32
  }
  func.func @transform_2(%arg0: i32) -> (i32, i32, i32) {
    %c0_i32 = arith.constant 0 : i32
    %c0_i32_0 = arith.constant 0 : i32
    %c0_i32_1 = arith.constant 0 : i32
    return %arg0, %c0_i32, %c0_i32_0 : i32, i32, i32
  }
}

</mosaic_0001>

<bundles_post_ra>
// kernel: tpu_custom_call.1
= control target key start
LH: loop header
LB: loop body
LE: loop exit
PB: predicated region body
PF: predicated region fallthrough
CT: control target
= control target key end

     0   :  { %vm13_vm0 = vcmask 130048   ;;  %s424_s0 = inlined_call_operand.vmem [shape: f32[2,8,16], index: 0, kind: input, shape index: {}]   ;;  %s425_s1 = inlined_call_operand.vmem [shape: f32[2,15,15], index: 1, kind: input, shape index: {}]   ;;  %s426_s2 = inlined_call_operand.hbm [shape: f32[2,1,128], index: 2, kind: output, shape index: {}]  }
   0x1   :  { %v12_v0 = vld [vmem:[%s424_s0] sm:$0xff] }
   0x2   :  { %7 = vsyncpa [#allocation3], 0  ;;  %v14_v1 = vsel %vm13_vm0, %v12_v0, -inf  ;;  %v303_v2 = vld [vmem:[%s424_s0 + $0x8] sm:$0xff]  ;;  %v39_v20 = vlaneseq  ;;  %vm75_vm10 = vcmask 64512   ;;  %vm105_vm11 = vcmask 121856  }
   0x3   :  { %15 = vmax.xlane.f32.xlu0 %v14_v1  ;;  %v151_v3 = vsel %vm13_vm0, %v303_v2, -inf  ;;  %vm109_vm12 = vcmask 120832   ;;  %s369_s20 = smov [#allocation2]   ;;  %s288_s24 = sshll.u32 %s426_s2, 4  ;;  %s289_s24 = int_to_ptr.hbm [resolvable:$true] %s288_s24 }
   0x4   :  { %v40_v26 = vshrl.u32 %v39_v20, 7  ;;  %s286_s21 = sshll.u32 %s369_s20, 4  ;;  %s370_s26 = smov 16   ;;  %s287_s21 = int_to_ptr.vmem [resolvable:$true] %s286_s21 }
   0x5   :  { %s371_s27 = smov 1  }
   0x6   :  { %vm41_vm6 = vcmp.lt.s32.totalorder %v40_v26, 7 }
   0xb   :  { %152 = vmax.xlane.f32.xlu0 %v151_v3 }
  0x76   :  { %v16_v4 = vpop.xlane.xlu0 %15 }
  0x77   :  { %v17_v5 = vsub.f32 %v12_v0, %v16_v4  ;;  %v129_v4 = vld [vmem:[%s425_s1] sm:$0xff] }
  0x79   :  { %v18_v6 = vmul.f32 1.442695, %v17_v5 }
  0x7b   :  { %319 = vpow2.f32 %v18_v6 }
  0x7e   :  { %v153_v7 = vpop.xlane.xlu0 %152 }
  0x7f   :  { %v154_v8 = vsub.f32 %v303_v2, %v153_v7 }
  0x81   :  { %v320_v9 = vpop.eup %319  ;;  %v155_v10 = vmul.f32 1.442695, %v154_v8  ;;  %v130_v8 = vld [vmem:[%s425_s1 + $0x8] sm:$0x7f] }
  0x82   :  { %v20_v11 = vsel %vm13_vm0, %v320_v9, 0.0 }
  0x83   :  { %321 = vpow2.f32 %v155_v10  ;;  %21 = vadd.xlane.f32.xlu1 %v20_v11  ;;  %v131_v10 = vadd.f32 1e-06, %v129_v4 }
  0x89   :  { %v322_v12 = vpop.eup %321 }
  0x8a   :  { %v157_v13 = vsel %vm13_vm0, %v322_v12, 0.0 }
  0x8b   :  { %158 = vadd.xlane.f32.xlu1 %v157_v13 }
  0xf6   :  { %v22_v14 = vpop.xlane.xlu1 %21 }
  0xf7   :  { %323 = vrcp.f32 %v22_v14  ;;  %v34_v19 = vand.u32 2147483648, %v22_v14  ;;  %v32_v22 = vand.u32 2147483647, %v22_v14  ;;  %vm28_vm2 = vweird.f32 %v22_v14 }
  0xf9   :  { %v35_v25 = vor.u32 1.1754944e-38, %v34_v19  ;;  %vm33_vm4 = vcmp.eq.f32.partialorder %v32_v22, 8.507059e+37 }
  0xfd   :  { %v324_v15 = vpop.eup %323 }
  0xfe   :  { %v24_v16 = vmul.f32 %v324_v15, %v22_v14  ;;  %v159_v17 = vpop.xlane.xlu1 %158  ;;  %vm29_vm1 = vweird.f32 %v324_v15  ;;  %v132_v14 = vadd.f32 1e-06, %v130_v8 }
  0xff   :  { %325 = vrcp.f32 %v159_v17  ;;  %vm30_vm3 = vmor %vm28_vm2, %vm29_vm1  ;;  %vm165_vm5 = vweird.f32 %v159_v17  ;;  %v171_v32 = vand.u32 2147483648, %v159_v17  ;;  %v169_v35 = vand.u32 2147483647, %v159_v17 }
 0x100   :  { %v25_v18 = vsub.f32 1.0, %v24_v16 }
 0x101   :  { %v172_v37 = vor.u32 1.1754944e-38, %v171_v32  ;;  %vm170_vm9 = vcmp.eq.f32.partialorder %v169_v35, 8.507059e+37 }
 0x102   :  { %v26_v21 = vmul.f32 %v324_v15, %v25_v18 }
 0x104   :  { %v27_v23 = vadd.f32 %v324_v15, %v26_v21 }
 0x105   :  { %v326_v24 = vpop.eup %325 }
 0x106   :  { %v161_v27 = vmul.f32 %v326_v24, %v159_v17  ;;  %v31_v28 = vsel %vm30_vm3, %v324_v15, %v27_v23  ;;  %vm166_vm7 = vweird.f32 %v326_v24 }
 0x107   :  { %v36_v29 = vsel %vm33_vm4, %v35_v25, %v31_v28  ;;  %vm167_vm8 = vmor %vm165_vm5, %vm166_vm7  ;;  %v307_v28 = vld [vmem:[%s425_s1 + $0x10] sm:$0xff] }
 0x108   :  { %v162_v30 = vsub.f32 1.0, %v161_v27  ;;  %v37_v31 = vmul.f32 %v320_v9, %v36_v29 }
 0x10a   :  { %v163_v33 = vmul.f32 %v326_v24, %v162_v30  ;;  %43 = vxpose.xlu2.b32.start.end [1/1] (short) (narrow) %v37_v31, 16  ;;  %v38_v34 = vrot.slane %v37_v31, 1  ;;  %v308_v31 = vld [vmem:[%s425_s1 + $0x18] sm:$0x7f] }
 0x10c   :  { %300 = vmatpush.msk.msra.mxu0 %vm41_vm6, %v38_v34  ;;  %309 = vmatpush.msk.msra.mxu2 %vm41_vm6, %v38_v34  ;;  %v164_v36 = vadd.f32 %v326_v24, %v163_v33  ;;  %v263_v33 = vadd.f32 1e-06, %v307_v28 }
 0x10e   :  { %v168_v38 = vsel %vm167_vm8, %v326_v24, %v164_v36 }
 0x10f   :  { %v173_v39 = vsel %vm170_vm9, %v172_v37, %v168_v38  ;;  %v264_v37 = vadd.f32 1e-06, %v308_v31 }
 0x110   :  { %v174_v40 = vmul.f32 %v322_v12, %v173_v39 }
 0x112   :  { %v175_v41 = vrot.slane %v174_v40, 1 }
 0x114   :  { %304 = vmatpush.msk.msra.mxu1 %vm41_vm6, %v175_v41  ;;  %310 = vmatpush.msk.msra.mxu3 %vm41_vm6, %v175_v41 }
 0x11a   :  { %177 = vxpose.xlu2.b32.start.end [1/1] (short) (narrow) %v174_v40, 16 }
 0x1a3   :  { %v59_v42 = vpop.trf.xlu2 }
 0x1a4   :  { %301 = vmatmul.msk.f32.vlgmr.msra.gmra.mxu0 %vm75_vm10, %v59_v42 }
 0x1ab   :  { %v60_v43 = vpop.trf.xlu2 }
 0x1ac   :  { %302 = vmatmul.msk.f32.vlgmr.msra.gmra.mxu2 %vm75_vm10, %v60_v43 }
 0x1b3   :  { %v193_v44 = vpop.trf.xlu2 }
 0x1b4   :  { %305 = vmatmul.msk.f32.vlgmr.msra.gmra.mxu1 %vm75_vm10, %v193_v44 }
 0x1bb   :  { %v194_v45 = vpop.trf.xlu2 }
 0x1bc   :  { %306 = vmatmul.msk.f32.vlgmr.msra.gmra.mxu3 %vm75_vm10, %v194_v45 }
 0x221   :  { %v99_v46 = vpop.f32.mrf.mxu0 }
 0x222   :  { %v106_v47 = vsel %vm105_vm11, %v99_v46, 0.0 }
 0x223   :  { %107 = vadd.xlane.f32.xlu0 %v106_v47 }
 0x22f   :  { %v102_v48 = vpop.f32.mrf.mxu2 }
 0x230   :  { %v110_v49 = vsel %vm109_vm12, %v102_v48, 0.0 }
 0x231   :  { %111 = vadd.xlane.f32.xlu1 %v110_v49  ;;  %v232_v50 = vpop.f32.mrf.mxu1 }
 0x232   :  { %v238_v51 = vsel %vm105_vm11, %v232_v50, 0.0 }
 0x233   :  { %239 = vadd.xlane.f32.xlu0 %v238_v51 }
 0x23f   :  { %v235_v52 = vpop.f32.mrf.mxu3 }
 0x240   :  { %v241_v53 = vsel %vm109_vm12, %v235_v52, 0.0 }
 0x241   :  { %242 = vadd.xlane.f32.xlu1 %v241_v53 }
 0x296   :  { %v108_v54 = vpop.xlane.xlu0 %107 }
 0x297   :  { %v113_v55 = vmax.f32 %v108_v54, 1.0 }
 0x299   :  { %v115_v56 = vmul.f32 1e-06, %v113_v55 }
 0x29b   :  { %v117_v57 = vadd.f32 %v115_v56, %v99_v46 }
 0x29d   :  { %327 = vlog2.f32 %v117_v57 }
 0x29e   :  { %329 = vlog2.f32 %v113_v55 }
 0x2a3   :  { %v328_v63 = vpop.eup %327 }
 0x2a4   :  { %v112_v58 = vpop.xlane.xlu1 %111  ;;  %v330_v1 = vpop.eup %329  ;;  %v120_v3 = vmul.f32 0.6931472, %v328_v63 }
 0x2a5   :  { %v114_v59 = vmax.f32 %v112_v58, 1.0  ;;  %v124_v5 = vmul.f32 0.6931472, %v330_v1 }
 0x2a6   :  { %v240_v60 = vpop.xlane.xlu0 %239 }
 0x2a7   :  { %v116_v61 = vmul.f32 1e-06, %v114_v59  ;;  %v244_v62 = vmax.f32 %v240_v60, 1.0  ;;  %331 = vlog2.f32 %v114_v59  ;;  %v127_v9 = vsub.f32 %v120_v3, %v124_v5 }
 0x2a9   :  { %v118_v0 = vadd.f32 %v116_v61, %v102_v48  ;;  %v246_v2 = vmul.f32 1e-06, %v244_v62  ;;  %v133_v17 = vmul.f32 %v131_v10, %v127_v9 }
 0x2ab   :  { %333 = vlog2.f32 %v118_v0  ;;  %v248_v7 = vadd.f32 %v246_v2, %v232_v50  ;;  %v135_v21 = vsel %vm105_vm11, %v133_v17, 0.0 }
 0x2ad   :  { %v332_v6 = vpop.eup %331  ;;  %335 = vlog2.f32 %v248_v7 }
 0x2ae   :  { %v126_v13 = vmul.f32 0.6931472, %v332_v6  ;;  %337 = vlog2.f32 %v244_v62 }
 0x2b1   :  { %v334_v11 = vpop.eup %333 }
 0x2b2   :  { %v122_v12 = vmul.f32 0.6931472, %v334_v11 }
 0x2b3   :  { %v336_v23 = vpop.eup %335 }
 0x2b4   :  { %v128_v15 = vsub.f32 %v122_v12, %v126_v13  ;;  %v243_v16 = vpop.xlane.xlu1 %242  ;;  %v338_v26 = vpop.eup %337  ;;  %v251_v27 = vmul.f32 0.6931472, %v336_v23 }
 0x2b5   :  { %v245_v18 = vmax.f32 %v243_v16, 1.0  ;;  %v255_v29 = vmul.f32 0.6931472, %v338_v26 }
 0x2b6   :  { %v134_v19 = vmul.f32 %v132_v14, %v128_v15 }
 0x2b7   :  { %v247_v20 = vmul.f32 1e-06, %v245_v18  ;;  %339 = vlog2.f32 %v245_v18  ;;  %v258_v32 = vsub.f32 %v251_v27, %v255_v29 }
 0x2b8   :  { %v136_v22 = vsel %vm109_vm12, %v134_v19, 0.0 }
 0x2b9   :  { %v249_v24 = vadd.f32 %v247_v20, %v235_v52  ;;  %v137_v25 = vadd.f32 %v136_v22, %v135_v21  ;;  %v265_v39 = vmul.f32 %v263_v33, %v258_v32 }
 0x2bb   :  { %341 = vlog2.f32 %v249_v24  ;;  %138 = vadd.xlane.f32.xlu2 %v137_v25  ;;  %v267_v41 = vsel %vm105_vm11, %v265_v39, 0.0 }
 0x2bd   :  { %v340_v30 = vpop.eup %339 }
 0x2be   :  { %v257_v36 = vmul.f32 0.6931472, %v340_v30 }
 0x2c1   :  { %v342_v34 = vpop.eup %341 }
 0x2c2   :  { %v253_v35 = vmul.f32 0.6931472, %v342_v34 }
 0x2c4   :  { %v259_v38 = vsub.f32 %v253_v35, %v257_v36 }
 0x2c6   :  { %v266_v40 = vmul.f32 %v264_v37, %v259_v38 }
 0x2c8   :  { %v268_v42 = vsel %vm109_vm12, %v266_v40, 0.0 }
 0x2c9   :  { %v269_v43 = vadd.f32 %v268_v42, %v267_v41 }
 0x2cb   :  { %270 = vadd.xlane.f32.xlu0 %v269_v43 }
 0x32e   :  { %v139_v44 = vpop.xlane.xlu2 %138 }
 0x32f   :  { %v140_v45 = vrot.slane %v139_v44, 4 }
 0x331   :  { %v141_v46 = vadd.f32 %v140_v45, %v139_v44 }
 0x333   :  { %v142_v47 = vrot.slane %v141_v46, 2 }
 0x335   :  { %v143_v48 = vadd.f32 %v142_v47, %v141_v46 }
 0x337   :  { %v144_v49 = vrot.slane %v143_v48, 1 }
 0x339   :  { %v145_v50 = vadd.f32 %v144_v49, %v143_v48 }
 0x33b   :  { %311 = vpush %v145_v50 }
 0x33e   :  { %v271_v51 = vpop.xlane.xlu0 %270 }
 0x33f   :  { %v272_v52 = vrot.slane %v271_v51, 4 }
 0x341   :  { %v273_v53 = vadd.f32 %v272_v52, %v271_v51 }
 0x343   :  { %v274_v54 = vrot.slane %v273_v53, 2 }
 0x345   :  { %v275_v55 = vadd.f32 %v274_v54, %v273_v53 }
 0x347   :  { %v276_v56 = vrot.slane %v275_v55, 1 }
 0x349   :  { %v277_v57 = vadd.f32 %v276_v56, %v275_v55 }
 0x34b   :  { %313 = vpush %v277_v57 }
 0x36c   :  { %s312_s1 = spop %311 }
 0x36d   :  { %v147_v58 = vstv %s312_s1 }
 0x36e   :  { %148 = vst [vmem:[#allocation2] sm:$0x1] %v147_v58 }
 0x37c   :  { %s314_s25 = spop %313 }
 0x37d   :  { %v279_v59 = vstv %s314_s25 }
 0x37e   :  { %281 = vst [vmem:[#allocation2 + $0x1] sm:$0x1] %v279_v59 }
 0x37f   :  { %294 = dma.vmem_to_hbm [thread:$0]  %s287_s21, 32, %s289_s24, [#allocation3], %s370_s26, %s370_s26, %s371_s27  }
 0x380   :  { %367 = dma.done.wait [#allocation3], 32  }
 0x381   :  { %368 = vsyncadd [#allocation3], 4294967264 }
 0x382   :  { %299 = vsyncpa [#allocation3], 1 }

</bundles_post_ra>
